<compile_context>
chip_gen: v7x
topology: tpu7x:2x2x1
jax: 0.10.0
libtpu: 0.0.40
codegen_flags: <defaults>
</compile_context>

<pallas_src>
import jax
import jax.numpy as jnp
from jax import lax
from jax.experimental import pallas as pl
from jax.experimental.pallas import tpu as pltpu

EPS = 1e-3  # BatchNorm2d eps


def _round_up(x, m):
    return (x + m - 1) // m * m


# ---------- pass 1: fused transposed-conv (single block matmul) + partial BN stats ----
def _conv_stats_kernel(x_ref, w_ref, y_ref, sum_ref, ssq_ref):
    # x_ref  : (TM, 4*Cin)    bf16  row tile of [x00 | x01 | x10 | x11]
    # w_ref  : (4*Cin, 4*Cout) bf16 block weight encoding the parity decomposition
    # y_ref  : (TM, 4*Cout)   f32   pre-BN conv output tile = [ee | eo | oe | oo]
    # sum_ref/ssq_ref : (1, 8, 4*Cout) f32 per-tile column partial sums (row 0 used)
    y = jnp.dot(x_ref[...], w_ref[...], preferred_element_type=jnp.float32)
    y_ref[...] = y
    c4 = y.shape[1]
    s = jnp.sum(y, axis=0, keepdims=True)            # (1, 4*Cout)
    ss = jnp.sum(y * y, axis=0, keepdims=True)       # (1, 4*Cout)
    sum_ref[...] = jnp.broadcast_to(s[:, None, :], (1, 8, c4))
    ssq_ref[...] = jnp.broadcast_to(ss[:, None, :], (1, 8, c4))


# ---------- pass 2: BN affine + ReLU (elementwise, pipelined over the same tiling) ----
def _bn_relu_kernel(y_ref, scale_ref, shift_ref, o_ref):
    o_ref[...] = jnp.maximum(y_ref[...] * scale_ref[...] + shift_ref[...], 0.0)


def upsampler_block(x_nchw, weight, bias, gamma, beta, *, tm=512):
    """UpsamplerBlock forward (training-mode BN).

    x_nchw: (N, Cin, H, W) f32; weight: (Cin, Cout, 3, 3) PyTorch ConvTranspose2d
    layout; bias/gamma/beta: (Cout,). Returns (N, Cout, 2H, 2W) f32.
    """
    del bias  # exactly cancelled by training-mode BatchNorm: BN(y + b) == BN(y)
    N, Cin, H, W = x_nchw.shape
    Cout = weight.shape[1]
    M = N * H * W
    C4i, C4o = 4 * Cin, 4 * Cout

    # ---- layout glue (plain JAX): shifted views -> one (M, 4*Cin) slab, bf16 ----
    x = jnp.transpose(x_nchw, (0, 2, 3, 1))                        # NHWC
    xp = jnp.pad(x, ((0, 0), (0, 1), (0, 1), (0, 0)))              # zero pad +1 row/col
    # TODO(synk): form the shifted views from overlapping row blocks inside the
    # kernel (pl.Element / manual DMA) to avoid materializing the 4x-wide slab in HBM.
    xcat = jnp.concatenate(
        [xp[:, :H, :W, :], xp[:, :H, 1:, :], xp[:, 1:, :W, :], xp[:, 1:, 1:, :]],
        axis=-1).reshape(M, C4i).astype(jnp.bfloat16)

    # Block weight (4*Cin, 4*Cout): row blocks = input shifts [x00|x01|x10|x11],
    # column blocks = parity outputs [ee|eo|oe|oo]. Zero blocks encode the
    # stride-2 transposed-conv parity decomposition.
    w9 = jnp.transpose(weight, (2, 3, 0, 1))                       # (ky, kx, Cin, Cout)
    z = jnp.zeros((Cin, Cout), weight.dtype)
    w_blk = jnp.concatenate([
        jnp.concatenate([w9[1, 1], w9[1, 2], w9[2, 1], w9[2, 2]], axis=1),   # x00
        jnp.concatenate([z,        w9[1, 0], z,        w9[2, 0]], axis=1),   # x01
        jnp.concatenate([z,        z,        w9[0, 1], w9[0, 2]], axis=1),   # x10
        jnp.concatenate([z,        z,        z,        w9[0, 0]], axis=1),   # x11
    ], axis=0).astype(jnp.bfloat16)

    # ---- M tiling (zero-row padding is exact: padded rows give conv output 0) ----
    tm = min(tm, _round_up(M, 8))          # NOTE: halve tm on v7x for the 64 MiB VMEM
    mp = _round_up(M, tm)
    nt = mp // tm
    if mp > M:
        xcat = jnp.pad(xcat, ((0, mp - M), (0, 0)))

    cparams = pltpu.CompilerParams(
        dimension_semantics=("parallel",),        # shard M across TCs on v7x
        vmem_limit_bytes=48 * 1024 * 1024)        # above v5e/v6e defaults, < v7x phys

    # ---- pass 1: conv (one block matmul) + per-tile partial sums ----
    y_pre, sums, ssqs = pl.pallas_call(
        _conv_stats_kernel,
        grid=(nt,),
        in_specs=[pl.BlockSpec((tm, C4i), lambda i: (i, 0)),
                  pl.BlockSpec((C4i, C4o), lambda i: (0, 0))],
        out_specs=(pl.BlockSpec((tm, C4o), lambda i: (i, 0)),
                   pl.BlockSpec((1, 8, C4o), lambda i: (i, 0, 0)),
                   pl.BlockSpec((1, 8, C4o), lambda i: (i, 0, 0))),
        out_shape=(jax.ShapeDtypeStruct((mp, C4o), jnp.float32),
                   jax.ShapeDtypeStruct((nt, 8, C4o), jnp.float32),
                   jax.ShapeDtypeStruct((nt, 8, C4o), jnp.float32)),
        compiler_params=cparams,
    )(xcat, w_blk)

    # ---- BN statistics combine (tiny, plain JAX, f32) ----
    count = jnp.float32(4 * M)                    # true element count (not padded)
    s = sums[:, 0, :].sum(axis=0).reshape(4, Cout).sum(axis=0)
    ss = ssqs[:, 0, :].sum(axis=0).reshape(4, Cout).sum(axis=0)
    mean = s / count
    var = jnp.maximum(ss / count - mean * mean, 0.0)   # biased variance, clamped
    inv = lax.rsqrt(var + EPS)
    scale_c = gamma.astype(jnp.float32) * inv
    shift_c = beta.astype(jnp.float32) - mean * scale_c
    scale = jnp.tile(scale_c, 4).reshape(1, C4o)       # same per-channel params
    shift = jnp.tile(shift_c, 4).reshape(1, C4o)       # replicated per parity block

    # ---- pass 2: BN affine + ReLU ----
    out_flat = pl.pallas_call(
        _bn_relu_kernel,
        grid=(nt,),
        in_specs=[pl.BlockSpec((tm, C4o), lambda i: (i, 0)),
                  pl.BlockSpec((1, C4o), lambda i: (0, 0)),
                  pl.BlockSpec((1, C4o), lambda i: (0, 0))],
        out_specs=pl.BlockSpec((tm, C4o), lambda i: (i, 0)),
        out_shape=jax.ShapeDtypeStruct((mp, C4o), jnp.float32),
        compiler_params=cparams,
    )(y_pre, scale, shift)

    # ---- layout glue: interleave parity blocks into (N, Cout, 2H, 2W) ----
    out = out_flat[:M].reshape(N, H, W, 2, 2, Cout)        # (.., row_par, col_par, C)
    out = jnp.transpose(out, (0, 1, 3, 2, 4, 5)).reshape(N, 2 * H, 2 * W, Cout)
    return jnp.transpose(out, (0, 3, 1, 2))                # back to NCHW


def _reference(x, weight, bias, gamma, beta):
    """Pure-JAX reference matching the PyTorch forward (training-mode BN)."""
    w_t = jnp.transpose(weight, (1, 0, 2, 3))[:, :, ::-1, ::-1]     # OIHW, flipped
    y = lax.conv_general_dilated(
        x, w_t, window_strides=(1, 1), padding=[(1, 2), (1, 2)],
        lhs_dilation=(2, 2), rhs_dilation=(1, 1),
        dimension_numbers=("NCHW", "OIHW", "NCHW"))
    y = y + bias[None, :, None, None]
    mean = y.mean(axis=(0, 2, 3), keepdims=True)
    var = ((y - mean) ** 2).mean(axis=(0, 2, 3), keepdims=True)     # biased
    y = (y - mean) / jnp.sqrt(var + EPS)
    y = y * gamma[None, :, None, None] + beta[None, :, None, None]
    return jnp.maximum(y, 0.0)


if __name__ == "__main__":
    N, Cin, H, W, Cout = 2, 4, 16, 16, 8
    key = jax.random.PRNGKey(0)
    k1, k2, k3, k4, k5 = jax.random.split(key, 5)
    x = jax.random.normal(k1, (N, Cin, H, W), jnp.float32)
    weight = 0.1 * jax.random.normal(k2, (Cin, Cout, 3, 3), jnp.float32)
    bias = 0.1 * jax.random.normal(k3, (Cout,), jnp.float32)
    gamma = 1.0 + 0.1 * jax.random.normal(k4, (Cout,), jnp.float32)
    beta = 0.1 * jax.random.normal(k5, (Cout,), jnp.float32)

    out = upsampler_block(x, weight, bias, gamma, beta)
    out = jax.block_until_ready(out)
    assert out.shape == (N, Cout, 2 * H, 2 * W), out.shape

    ref = _reference(x, weight, bias, gamma, beta)
    max_err = float(jnp.max(jnp.abs(out - ref)))
    # bf16 activation/weight storage -> slightly looser tolerance than pure f32.
    assert jnp.allclose(out, ref, atol=7.5e-2, rtol=7.5e-2), max_err

    print("KERNEL_OK")
</pallas_src>

<mosaic_0001>
module attributes {stable_mosaic.version = 11 : i64} {
  func.func @_conv_stats_kernel(%arg0: i32, %arg1: memref<512x16xbf16, #tpu.memory_space<vmem>>, %arg2: memref<16x32xbf16, #tpu.memory_space<vmem>>, %arg3: memref<512x32xf32, #tpu.memory_space<vmem>>, %arg4: memref<1x8x32xf32, #tpu.memory_space<vmem>>, %arg5: memref<1x8x32xf32, #tpu.memory_space<vmem>>) attributes {dimension_semantics = [#tpu.dimension_semantics<parallel>], iteration_bounds = array<i64: 1>, scalar_prefetch = 0 : i64, scratch_operands = 0 : i64, tpu.core_type = #tpu.core_type<tc>, window_params = [{transform_indices = @transform_0, window_bounds = array<i64: 512, 16>}, {pipeline_mode = #tpu.pipeline_mode<synchronous>, transform_indices = @transform_1, window_bounds = array<i64: 16, 32>}, {transform_indices = @transform_2, window_bounds = array<i64: 512, 32>}, {transform_indices = @transform_3, window_bounds = array<i64: 1, 8, 32>}, {transform_indices = @transform_4, window_bounds = array<i64: 1, 8, 32>}]} {
    %c0 = arith.constant 0 : index
    %c0_0 = arith.constant 0 : index
    %0 = vector.load %arg1[%c0, %c0_0] : memref<512x16xbf16, #tpu.memory_space<vmem>>, vector<512x16xbf16>
    %c0_1 = arith.constant 0 : index
    %c0_2 = arith.constant 0 : index
    %1 = vector.load %arg2[%c0_1, %c0_2] : memref<16x32xbf16, #tpu.memory_space<vmem>>, vector<16x32xbf16>
    %cst = arith.constant dense<0.000000e+00> : vector<512x32xf32>
    %2 = tpu.matmul %0, %1, %cst {dimension_numbers = #tpu.dot_dimension_numbers<[1], [0], [0], [1], [0, 0, 1, 1], [], []>} : vector<512x16xbf16>, vector<16x32xbf16>, vector<512x32xf32> -> vector<512x32xf32>
    %c0_3 = arith.constant 0 : index
    %c0_4 = arith.constant 0 : index
    %3 = vector.load %arg3[%c0_3, %c0_4] : memref<512x32xf32, #tpu.memory_space<vmem>>, vector<512x32xf32>
    tpu.vector_store %arg3[%c0_3, %c0_4], %2 {strides = array<i32>} : memref<512x32xf32, #tpu.memory_space<vmem>>, vector<512x32xf32>,
    %cst_5 = arith.constant dense<0.000000e+00> : vector<32xf32>
    %4 = vector.multi_reduction <add>, %2, %cst_5 [0] : vector<512x32xf32> to vector<32xf32>
    %5 = vector.shape_cast %4 : vector<32xf32> to vector<1x32xf32>
    %6 = arith.mulf %2, %2 : vector<512x32xf32>
    %cst_6 = arith.constant dense<0.000000e+00> : vector<32xf32>
    %7 = vector.multi_reduction <add>, %6, %cst_6 [0] : vector<512x32xf32> to vector<32xf32>
    %8 = vector.shape_cast %7 : vector<32xf32> to vector<1x32xf32>
    %9 = vector.shape_cast %5 : vector<1x32xf32> to vector<1x1x32xf32>
    %10 = vector.shape_cast %9 : vector<1x1x32xf32> to vector<1x1x32xf32>
    %11 = vector.broadcast %10 : vector<1x1x32xf32> to vector<1x8x32xf32>
    %c0_7 = arith.constant 0 : index
    %c0_8 = arith.constant 0 : index
    %c0_9 = arith.constant 0 : index
    %12 = vector.load %arg4[%c0_7, %c0_8, %c0_9] : memref<1x8x32xf32, #tpu.memory_space<vmem>>, vector<1x8x32xf32>
    tpu.vector_store %arg4[%c0_7, %c0_8, %c0_9], %11 {strides = array<i32>} : memref<1x8x32xf32, #tpu.memory_space<vmem>>, vector<1x8x32xf32>,
    %13 = vector.shape_cast %8 : vector<1x32xf32> to vector<1x1x32xf32>
    %14 = vector.shape_cast %13 : vector<1x1x32xf32> to vector<1x1x32xf32>
    %15 = vector.broadcast %14 : vector<1x1x32xf32> to vector<1x8x32xf32>
    %c0_10 = arith.constant 0 : index
    %c0_11 = arith.constant 0 : index
    %c0_12 = arith.constant 0 : index
    %16 = vector.load %arg5[%c0_10, %c0_11, %c0_12] : memref<1x8x32xf32, #tpu.memory_space<vmem>>, vector<1x8x32xf32>
    tpu.vector_store %arg5[%c0_10, %c0_11, %c0_12], %15 {strides = array<i32>} : memref<1x8x32xf32, #tpu.memory_space<vmem>>, vector<1x8x32xf32>,
    return
  }
  func.func @transform_0(%arg0: i32) -> (i32, i32) {
    %c0_i32 = arith.constant 0 : i32
    %c0_i32_0 = arith.constant 0 : i32
    return %arg0, %c0_i32 : i32, i32
  }
  func.func @transform_1(%arg0: i32) -> (i32, i32) {
    %c0_i32 = arith.constant 0 : i32
    %c0_i32_0 = arith.constant 0 : i32
    %c0_i32_1 = arith.constant 0 : i32
    return %c0_i32, %c0_i32_0 : i32, i32
  }
  func.func @transform_2(%arg0: i32) -> (i32, i32) {
    %c0_i32 = arith.constant 0 : i32
    %c0_i32_0 = arith.constant 0 : i32
    return %arg0, %c0_i32 : i32, i32
  }
  func.func @transform_3(%arg0: i32) -> (i32, i32, i32) {
    %c0_i32 = arith.constant 0 : i32
    %c0_i32_0 = arith.constant 0 : i32
    %c0_i32_1 = arith.constant 0 : i32
    return %arg0, %c0_i32, %c0_i32_0 : i32, i32, i32
  }
  func.func @transform_4(%arg0: i32) -> (i32, i32, i32) {
    %c0_i32 = arith.constant 0 : i32
    %c0_i32_0 = arith.constant 0 : i32
    %c0_i32_1 = arith.constant 0 : i32
    return %arg0, %c0_i32, %c0_i32_0 : i32, i32, i32
  }
}

</mosaic_0001>

<bundles_post_ra>
// kernel: tpu_custom_call.1
= control target key start
LH: loop header
LB: loop body
LE: loop exit
PB: predicated region body
PF: predicated region fallthrough
CT: control target
= control target key end

     0   :  { %10 = vsyncpa [#allocation3], 0  ;;  %vm249_vm0 = vcmask 130048   ;;  %s2073_s0 = inlined_call_operand.vmem [shape: bf16[512,16], index: 0, kind: input, shape index: {}]   ;;  %s2074_s1 = inlined_call_operand.vmem [shape: bf16[16,32], index: 1, kind: input, shape index: {}]   ;;  %s2075_s2 = inlined_call_operand.vmem [shape: f32[512,32], index: 2, kind: output, shape index: {0}]   ;;  %s2076_s3 = inlined_call_operand.hbm [shape: f32[1,8,32], index: 3, kind: output, shape index: {1}]   ;;  %s2077_s4 = inlined_call_operand.hbm [shape: f32[1,8,32], index: 4, kind: output, shape index: {2}]  }
   0x1   :  { %v1232_v0 = vld [vmem:[%s2074_s1] sm:$0xff]   ;;  %v1234_v2 = vld [vmem:[%s2073_s0 + $0x8] sm:$0xff]   ;;  %v1235_v3 = vld [vmem:[%s2073_s0 + $0x10] sm:$0xff]  }
   0x2   :  { %v1233_v1 = vld [vmem:[%s2073_s0] sm:$0xff]   ;;  %1162 = vmatprep.subr.bf16.mxu0 %v1232_v0  ;;  %1228 = vmatprep.subr.bf16.mxu1 %v1232_v0  ;;  %v1236_v4 = vld [vmem:[%s2073_s0 + $0x18] sm:$0xff]   ;;  %v1238_v6 = vld [vmem:[%s2073_s0 + $0x28] sm:$0xff]  }
   0x3   :  { %1163 = vmatpush3.bf16.msra.mxu0 %v1232_v0  ;;  %1164 = vmatprep.mubr.msk.bf16.mxu0 %vm249_vm0, %v1233_v1  ;;  %v1237_v5 = vld [vmem:[%s2073_s0 + $0x20] sm:$0xff]   ;;  %v1239_v7 = vld [vmem:[%s2073_s0 + $0x30] sm:$0xff]   ;;  %v1250_v9 = vld [vmem:[%s2073_s0 + $0x88] sm:$0xff]  }
   0x4   :  { %1229 = vmatpush3.bf16.msra.mxu1 %v1232_v0  ;;  %v1249_v8 = vld [vmem:[%s2073_s0 + $0x80] sm:$0xff]   ;;  %v1251_v10 = vld [vmem:[%s2073_s0 + $0x90] sm:$0xff]   ;;  %v1252_v11 = vld [vmem:[%s2073_s0 + $0x98] sm:$0xff]  }
   0x5   :  { %1196 = vmatprep.mubr.msk.bf16.mxu1 %vm249_vm0, %v1249_v8  ;;  %v1253_v12 = vld [vmem:[%s2073_s0 + $0xa0] sm:$0xff]   ;;  %v1240_v13 = vld [vmem:[%s2073_s0 + $0x38] sm:$0xff]   ;;  %v1254_v15 = vld [vmem:[%s2073_s0 + $0xa8] sm:$0xff]  }
   0x6   :  { %1165 = vmatmul.mubr.msk.bf16.vlgmr.msra.gmra.mrb[0].mxu0 %vm249_vm0, %v1234_v2  ;;  %v1241_v14 = vld [vmem:[%s2073_s0 + $0x40] sm:$0xff]   ;;  %v1255_v16 = vld [vmem:[%s2073_s0 + $0xb0] sm:$0xff]  }
   0x7   :  { %1168 = vmatprep.mubr.msk.bf16.mxu0 %vm249_vm0, %v1235_v3  ;;  %1197 = vmatmul.mubr.msk.bf16.vlgmr.msra.gmra.mrb[0].mxu1 %vm249_vm0, %v1250_v9 }
   0x8   :  { %1200 = vmatprep.mubr.msk.bf16.mxu1 %vm249_vm0, %v1251_v10 }
   0xe   :  { %1169 = vmatmul.mubr.msk.bf16.gmra.mrb[4].mxu0 %vm249_vm0, %v1236_v4 }
   0xf   :  { %1172 = vmatprep.mubr.msk.bf16.mxu0 %vm249_vm0, %v1237_v5  ;;  %1201 = vmatmul.mubr.msk.bf16.gmra.mrb[4].mxu1 %vm249_vm0, %v1252_v11 }
  0x10   :  { %1204 = vmatprep.mubr.msk.bf16.mxu1 %vm249_vm0, %v1253_v12 }
  0x16   :  { %1173 = vmatmul.mubr.msk.bf16.gmra.mrb[8].mxu0 %vm249_vm0, %v1238_v6 }
  0x17   :  { %1176 = vmatprep.mubr.msk.bf16.mxu0 %vm249_vm0, %v1239_v7 }
  0x1e   :  { %1177 = vmatmul.mubr.msk.bf16.gmra.mrb[12].mxu0 %vm249_vm0, %v1240_v13 }
  0x1f   :  { %1180 = vmatprep.mubr.msk.bf16.mxu0 %vm249_vm0, %v1241_v14 }
  0x20   :  { %11 = vsyncpa [#allocation5], 0  ;;  %v1242_v17 = vld [vmem:[%s2073_s0 + $0x48] sm:$0xff]   ;;  %v1243_v18 = vld [vmem:[%s2073_s0 + $0x50] sm:$0xff]   ;;  %1205 = vmatmul.mubr.msk.bf16.gmra.mrb[8].mxu1 %vm249_vm0, %v1254_v15  ;;  %vm635_vm1 = vcmask 261120   ;;  %s1314_s16 = smov [#allocation4]  }
  0x21   :  { %1208 = vmatprep.mubr.msk.bf16.mxu1 %vm249_vm0, %v1255_v16  ;;  %v1256_v19 = vld [vmem:[%s2073_s0 + $0xb8] sm:$0xff]   ;;  %v1257_v20 = vld [vmem:[%s2073_s0 + $0xc0] sm:$0xff]   ;;  %v1258_v23 = vld [vmem:[%s2073_s0 + $0xc8] sm:$0xff]   ;;  %s1050_s17 = sshll.u32 %s1314_s16, 4  ;;  %s1051_s17 = int_to_ptr.vmem [resolvable:$true] %s1050_s17 }
  0x22   :  { %v1244_v21 = vld [vmem:[%s2073_s0 + $0x58] sm:$0xff]   ;;  %v1245_v22 = vld [vmem:[%s2073_s0 + $0x60] sm:$0xff]   ;;  %v1259_v24 = vld [vmem:[%s2073_s0 + $0xd0] sm:$0xff]  }
  0x23   :  { %v1246_v25 = vld [vmem:[%s2073_s0 + $0x68] sm:$0xff]   ;;  %v1247_v26 = vld [vmem:[%s2073_s0 + $0x70] sm:$0xff]   ;;  %v1260_v27 = vld [vmem:[%s2073_s0 + $0xd8] sm:$0xff]  }
  0x24   :  { %v1261_v28 = vld [vmem:[%s2073_s0 + $0xe0] sm:$0xff]   ;;  %v1248_v29 = vld [vmem:[%s2073_s0 + $0x78] sm:$0xff]   ;;  %v1262_v30 = vld [vmem:[%s2073_s0 + $0xe8] sm:$0xff]  }
  0x25   :  { %v1263_v31 = vld [vmem:[%s2073_s0 + $0xf0] sm:$0xff]   ;;  %v1264_v32 = vld [vmem:[%s2073_s0 + $0xf8] sm:$0xff]  }
  0x26   :  { %1181 = vmatmul.mubr.msk.bf16.gmra.mrb[16].mxu0 %vm249_vm0, %v1242_v17 }
  0x27   :  { %1184 = vmatprep.mubr.msk.bf16.mxu0 %vm249_vm0, %v1243_v18 }
  0x28   :  { %1209 = vmatmul.mubr.msk.bf16.gmra.mrb[12].mxu1 %vm249_vm0, %v1256_v19 }
  0x29   :  { %1212 = vmatprep.mubr.msk.bf16.mxu1 %vm249_vm0, %v1257_v20 }
  0x2e   :  { %1185 = vmatmul.mubr.msk.bf16.gmra.mrb[20].mxu0 %vm249_vm0, %v1244_v21 }
  0x2f   :  { %1188 = vmatprep.mubr.msk.bf16.mxu0 %vm249_vm0, %v1245_v22 }
  0x30   :  { %1213 = vmatmul.mubr.msk.bf16.gmra.mrb[16].mxu1 %vm249_vm0, %v1258_v23 }
  0x31   :  { %1216 = vmatprep.mubr.msk.bf16.mxu1 %vm249_vm0, %v1259_v24 }
  0x36   :  { %1189 = vmatmul.mubr.msk.bf16.gmra.mrb[24].mxu0 %vm249_vm0, %v1246_v25 }
  0x37   :  { %1192 = vmatprep.mubr.msk.bf16.mxu0 %vm249_vm0, %v1247_v26 }
  0x38   :  { %1217 = vmatmul.mubr.msk.bf16.gmra.mrb[20].mxu1 %vm249_vm0, %v1260_v27 }
  0x39   :  { %1220 = vmatprep.mubr.msk.bf16.mxu1 %vm249_vm0, %v1261_v28 }
  0x3e   :  { %1193 = vmatmul.mubr.msk.bf16.gmra.mrb[28].mxu0 %vm249_vm0, %v1248_v29 }
  0x40   :  { %1221 = vmatmul.mubr.msk.bf16.gmra.mrb[24].mxu1 %vm249_vm0, %v1262_v30 }
  0x41   :  { %1224 = vmatprep.mubr.msk.bf16.mxu1 %vm249_vm0, %v1263_v31 }
  0x48   :  { %1225 = vmatmul.mubr.msk.bf16.gmra.mrb[28].mxu1 %vm249_vm0, %v1264_v32 }
  0xd9   :  { %v1166_v33 = vpop.f32.mrb[0].mxu0 }
  0xda   :  { %638 = vst.msk [vmem:[%s2075_s2 + $0x10] sm:$0xff] %vm635_vm1, %v1166_v33  ;;  %v380_v34 = vpop.f32.mrb[1].mxu0  ;;  %v835_v38 = vmul.f32 %v1166_v33, %v1166_v33  ;;  %v703_v43 = vsel %vm635_vm1, %v1166_v33, 0.0  ;;  %v1516_v7 = vpop.f32.mrb[0].mxu1 }
  0xdb   :  { %636 = vst.msk [vmem:[%s2075_s2] sm:$0xff] %vm635_vm1, %v380_v34  ;;  %v833_v35 = vmul.f32 %v380_v34, %v380_v34  ;;  %v1167_v36 = vpop.f32.mrb[2].mxu0  ;;  %v700_v39 = vsel %vm635_vm1, %v380_v34, 0.0  ;;  %670 = vst.msk [vmem:[%s2075_s2 + $0x110] sm:$0xff] %vm635_vm1, %v1516_v7  ;;  %v1523_v10 = vpop.f32.mrb[1].mxu1 }
  0xdc   :  { %639 = vst.msk [vmem:[%s2075_s2 + $0x18] sm:$0xff] %vm635_vm1, %v1167_v36  ;;  %v383_v37 = vpop.f32.mrb[3].mxu0  ;;  %v836_v45 = vmul.f32 %v1167_v36, %v1167_v36  ;;  %v900_v49 = vsel %vm635_vm1, %v835_v38, 0.0  ;;  %v705_v50 = vsel %vm635_vm1, %v1167_v36, 0.0  ;;  %668 = vst.msk [vmem:[%s2075_s2 + $0x100] sm:$0xff] %vm635_vm1, %v1523_v10  ;;  %v1532_v14 = vpop.f32.mrb[2].mxu1 }
  0xdd   :  { %637 = vst.msk [vmem:[%s2075_s2 + $0x8] sm:$0xff] %vm635_vm1, %v383_v37  ;;  %v701_v40 = vsel %vm635_vm1, %v383_v37, 0.0  ;;  %v834_v41 = vmul.f32 %v383_v37, %v383_v37  ;;  %v897_v44 = vsel %vm635_vm1, %v833_v35, 0.0  ;;  %671 = vst.msk [vmem:[%s2075_s2 + $0x118] sm:$0xff] %vm635_vm1, %v1532_v14  ;;  %v1543_v18 = vpop.f32.mrb[3].mxu1 }
  0xde   :  { %v702_v42 = vadd.f32 %v701_v40, %v700_v39  ;;  %v902_v55 = vsel %vm635_vm1, %v836_v45, 0.0  ;;  %669 = vst.msk [vmem:[%s2075_s2 + $0x108] sm:$0xff] %vm635_vm1, %v1543_v18 }
  0xdf   :  { %v898_v46 = vsel %vm635_vm1, %v834_v41, 0.0 }
  0xe0   :  { %v704_v47 = vadd.f32 %v703_v43, %v702_v42  ;;  %v899_v48 = vadd.f32 %v898_v46, %v897_v44 }
  0xe1   :  { %v1170_v51 = vpop.f32.mrb[4].mxu0 }
  0xe2   :  { %v901_v52 = vadd.f32 %v900_v49, %v899_v48  ;;  %642 = vst.msk [vmem:[%s2075_s2 + $0x30] sm:$0xff] %vm635_vm1, %v1170_v51  ;;  %v396_v53 = vpop.f32.mrb[5].mxu0  ;;  %v706_v54 = vadd.f32 %v705_v50, %v704_v47  ;;  %v839_v62 = vmul.f32 %v1170_v51, %v1170_v51  ;;  %v711_v4 = vsel %vm635_vm1, %v1170_v51, 0.0  ;;  %v1568_v35 = vpop.f32.mrb[4].mxu1 }
  0xe3   :  { %640 = vst.msk [vmem:[%s2075_s2 + $0x20] sm:$0xff] %vm635_vm1, %v396_v53  ;;  %v707_v56 = vsel %vm635_vm1, %v396_v53, 0.0  ;;  %v837_v57 = vmul.f32 %v396_v53, %v396_v53  ;;  %v1171_v58 = vpop.f32.mrb[6].mxu0  ;;  %674 = vst.msk [vmem:[%s2075_s2 + $0x130] sm:$0xff] %vm635_vm1, %v1568_v35  ;;  %v1575_v38 = vpop.f32.mrb[5].mxu1 }
  0xe4   :  { %v708_v59 = vadd.f32 %v707_v56, %v706_v54  ;;  %v903_v60 = vadd.f32 %v902_v55, %v901_v52  ;;  %643 = vst.msk [vmem:[%s2075_s2 + $0x38] sm:$0xff] %vm635_vm1, %v1171_v58  ;;  %v399_v61 = vpop.f32.mrb[7].mxu0  ;;  %v840_v5 = vmul.f32 %v1171_v58, %v1171_v58  ;;  %v908_v11 = vsel %vm635_vm1, %v839_v62, 0.0  ;;  %672 = vst.msk [vmem:[%s2075_s2 + $0x120] sm:$0xff] %vm635_vm1, %v1575_v38  ;;  %v1584_v42 = vpop.f32.mrb[6].mxu1 }
  0xe5   :  { %v904_v63 = vsel %vm635_vm1, %v837_v57, 0.0  ;;  %641 = vst.msk [vmem:[%s2075_s2 + $0x28] sm:$0xff] %vm635_vm1, %v399_v61  ;;  %v709_v0 = vsel %vm635_vm1, %v399_v61, 0.0  ;;  %v838_v1 = vmul.f32 %v399_v61, %v399_v61  ;;  %v713_v12 = vsel %vm635_vm1, %v1171_v58, 0.0  ;;  %675 = vst.msk [vmem:[%s2075_s2 + $0x138] sm:$0xff] %vm635_vm1, %v1584_v42  ;;  %v1595_v46 = vpop.f32.mrb[7].mxu1 }
  0xe6   :  { %v905_v2 = vadd.f32 %v904_v63, %v903_v60  ;;  %v710_v3 = vadd.f32 %v709_v0, %v708_v59  ;;  %v910_v19 = vsel %vm635_vm1, %v840_v5, 0.0  ;;  %673 = vst.msk [vmem:[%s2075_s2 + $0x128] sm:$0xff] %vm635_vm1, %v1595_v46 }
  0xe7   :  { %v906_v6 = vsel %vm635_vm1, %v838_v1, 0.0 }
  0xe8   :  { %v712_v8 = vadd.f32 %v711_v4, %v710_v3  ;;  %v907_v9 = vadd.f32 %v906_v6, %v905_v2 }
  0xe9   :  { %v1174_v13 = vpop.f32.mrb[8].mxu0 }
  0xea   :  { %v909_v15 = vadd.f32 %v908_v11, %v907_v9  ;;  %646 = vst.msk [vmem:[%s2075_s2 + $0x50] sm:$0xff] %vm635_vm1, %v1174_v13  ;;  %v412_v16 = vpop.f32.mrb[9].mxu0  ;;  %v714_v17 = vadd.f32 %v713_v12, %v712_v8  ;;  %v843_v26 = vmul.f32 %v1174_v13, %v1174_v13  ;;  %v719_v32 = vsel %vm635_vm1, %v1174_v13, 0.0 }
  0xeb   :  { %644 = vst.msk [vmem:[%s2075_s2 + $0x40] sm:$0xff] %vm635_vm1, %v412_v16  ;;  %v715_v20 = vsel %vm635_vm1, %v412_v16, 0.0  ;;  %v841_v21 = vmul.f32 %v412_v16, %v412_v16  ;;  %v1175_v22 = vpop.f32.mrb[10].mxu0 }
  0xec   :  { %v716_v23 = vadd.f32 %v715_v20, %v714_v17  ;;  %v911_v24 = vadd.f32 %v910_v19, %v909_v15  ;;  %647 = vst.msk [vmem:[%s2075_s2 + $0x58] sm:$0xff] %vm635_vm1, %v1175_v22  ;;  %v415_v25 = vpop.f32.mrb[11].mxu0  ;;  %v844_v33 = vmul.f32 %v1175_v22, %v1175_v22  ;;  %v916_v39 = vsel %vm635_vm1, %v843_v26, 0.0 }
  0xed   :  { %v912_v27 = vsel %vm635_vm1, %v841_v21, 0.0  ;;  %645 = vst.msk [vmem:[%s2075_s2 + $0x48] sm:$0xff] %vm635_vm1, %v415_v25  ;;  %v717_v28 = vsel %vm635_vm1, %v415_v25, 0.0  ;;  %v842_v29 = vmul.f32 %v415_v25, %v415_v25  ;;  %v721_v40 = vsel %vm635_vm1, %v1175_v22, 0.0 }
  0xee   :  { %v913_v30 = vadd.f32 %v912_v27, %v911_v24  ;;  %v718_v31 = vadd.f32 %v717_v28, %v716_v23  ;;  %v918_v47 = vsel %vm635_vm1, %v844_v33, 0.0 }
  0xef   :  { %v914_v34 = vsel %vm635_vm1, %v842_v29, 0.0 }
  0xf0   :  { %v720_v36 = vadd.f32 %v719_v32, %v718_v31  ;;  %v915_v37 = vadd.f32 %v914_v34, %v913_v30 }
  0xf1   :  { %v1178_v41 = vpop.f32.mrb[12].mxu0 }
  0xf2   :  { %v917_v43 = vadd.f32 %v916_v39, %v915_v37  ;;  %650 = vst.msk [vmem:[%s2075_s2 + $0x70] sm:$0xff] %vm635_vm1, %v1178_v41  ;;  %v428_v44 = vpop.f32.mrb[13].mxu0  ;;  %v722_v45 = vadd.f32 %v721_v40, %v720_v36  ;;  %v847_v54 = vmul.f32 %v1178_v41, %v1178_v41  ;;  %v727_v60 = vsel %vm635_vm1, %v1178_v41, 0.0 }
  0xf3   :  { %648 = vst.msk [vmem:[%s2075_s2 + $0x60] sm:$0xff] %vm635_vm1, %v428_v44  ;;  %v723_v48 = vsel %vm635_vm1, %v428_v44, 0.0  ;;  %v845_v49 = vmul.f32 %v428_v44, %v428_v44  ;;  %v1179_v50 = vpop.f32.mrb[14].mxu0  ;;  %v1620_v63 = vpop.f32.mrb[8].mxu1 }
  0xf4   :  { %v724_v51 = vadd.f32 %v723_v48, %v722_v45  ;;  %v919_v52 = vadd.f32 %v918_v47, %v917_v43  ;;  %651 = vst.msk [vmem:[%s2075_s2 + $0x78] sm:$0xff] %vm635_vm1, %v1179_v50  ;;  %v431_v53 = vpop.f32.mrb[15].mxu0  ;;  %v848_v61 = vmul.f32 %v1179_v50, %v1179_v50  ;;  %678 = vst.msk [vmem:[%s2075_s2 + $0x150] sm:$0xff] %vm635_vm1, %v1620_v63  ;;  %v1627_v2 = vpop.f32.mrb[9].mxu1  ;;  %v924_v3 = vsel %vm635_vm1, %v847_v54, 0.0 }
  0xf5   :  { %v920_v55 = vsel %vm635_vm1, %v845_v49, 0.0  ;;  %649 = vst.msk [vmem:[%s2075_s2 + $0x68] sm:$0xff] %vm635_vm1, %v431_v53  ;;  %v725_v56 = vsel %vm635_vm1, %v431_v53, 0.0  ;;  %v846_v57 = vmul.f32 %v431_v53, %v431_v53  ;;  %v729_v4 = vsel %vm635_vm1, %v1179_v50, 0.0  ;;  %676 = vst.msk [vmem:[%s2075_s2 + $0x140] sm:$0xff] %vm635_vm1, %v1627_v2  ;;  %v1636_v6 = vpop.f32.mrb[10].mxu1 }
  0xf6   :  { %v921_v58 = vadd.f32 %v920_v55, %v919_v52  ;;  %v726_v59 = vadd.f32 %v725_v56, %v724_v51  ;;  %679 = vst.msk [vmem:[%s2075_s2 + $0x158] sm:$0xff] %vm635_vm1, %v1636_v6  ;;  %v1647_v12 = vpop.f32.mrb[11].mxu1  ;;  %v926_v13 = vsel %vm635_vm1, %v848_v61, 0.0 }
  0xf7   :  { %v922_v62 = vsel %vm635_vm1, %v846_v57, 0.0  ;;  %677 = vst.msk [vmem:[%s2075_s2 + $0x148] sm:$0xff] %vm635_vm1, %v1647_v12 }
  0xf8   :  { %v728_v0 = vadd.f32 %v727_v60, %v726_v59  ;;  %v923_v1 = vadd.f32 %v922_v62, %v921_v58 }
  0xf9   :  { %v1182_v5 = vpop.f32.mrb[16].mxu0 }
  0xfa   :  { %v925_v8 = vadd.f32 %v924_v3, %v923_v1  ;;  %654 = vst.msk [vmem:[%s2075_s2 + $0x90] sm:$0xff] %vm635_vm1, %v1182_v5  ;;  %v444_v9 = vpop.f32.mrb[17].mxu0  ;;  %v730_v11 = vadd.f32 %v729_v4, %v728_v0  ;;  %v851_v22 = vmul.f32 %v1182_v5, %v1182_v5  ;;  %v735_v28 = vsel %vm635_vm1, %v1182_v5, 0.0 }
  0xfb   :  { %652 = vst.msk [vmem:[%s2075_s2 + $0x80] sm:$0xff] %vm635_vm1, %v444_v9  ;;  %v731_v15 = vsel %vm635_vm1, %v444_v9, 0.0  ;;  %v849_v16 = vmul.f32 %v444_v9, %v444_v9  ;;  %v1183_v17 = vpop.f32.mrb[18].mxu0  ;;  %v1672_v31 = vpop.f32.mrb[12].mxu1 }
  0xfc   :  { %v732_v19 = vadd.f32 %v731_v15, %v730_v11  ;;  %v927_v20 = vadd.f32 %v926_v13, %v925_v8  ;;  %655 = vst.msk [vmem:[%s2075_s2 + $0x98] sm:$0xff] %vm635_vm1, %v1183_v17  ;;  %v447_v21 = vpop.f32.mrb[19].mxu0  ;;  %v852_v29 = vmul.f32 %v1183_v17, %v1183_v17  ;;  %682 = vst.msk [vmem:[%s2075_s2 + $0x170] sm:$0xff] %vm635_vm1, %v1672_v31  ;;  %v1679_v34 = vpop.f32.mrb[13].mxu1  ;;  %v932_v36 = vsel %vm635_vm1, %v851_v22, 0.0 }
  0xfd   :  { %v928_v23 = vsel %vm635_vm1, %v849_v16, 0.0  ;;  %653 = vst.msk [vmem:[%s2075_s2 + $0x88] sm:$0xff] %vm635_vm1, %v447_v21  ;;  %v733_v24 = vsel %vm635_vm1, %v447_v21, 0.0  ;;  %v850_v25 = vmul.f32 %v447_v21, %v447_v21  ;;  %v737_v37 = vsel %vm635_vm1, %v1183_v17, 0.0  ;;  %680 = vst.msk [vmem:[%s2075_s2 + $0x160] sm:$0xff] %vm635_vm1, %v1679_v34  ;;  %v1688_v40 = vpop.f32.mrb[14].mxu1 }
  0xfe   :  { %v929_v26 = vadd.f32 %v928_v23, %v927_v20  ;;  %v734_v27 = vadd.f32 %v733_v24, %v732_v19  ;;  %683 = vst.msk [vmem:[%s2075_s2 + $0x178] sm:$0xff] %vm635_vm1, %v1688_v40  ;;  %v1699_v45 = vpop.f32.mrb[15].mxu1  ;;  %v934_v47 = vsel %vm635_vm1, %v852_v29, 0.0 }
  0xff   :  { %v930_v30 = vsel %vm635_vm1, %v850_v25, 0.0  ;;  %681 = vst.msk [vmem:[%s2075_s2 + $0x168] sm:$0xff] %vm635_vm1, %v1699_v45 }
 0x100   :  { %v736_v32 = vadd.f32 %v735_v28, %v734_v27  ;;  %v931_v33 = vadd.f32 %v930_v30, %v929_v26 }
 0x101   :  { %v1186_v39 = vpop.f32.mrb[20].mxu0 }
 0x102   :  { %v933_v41 = vadd.f32 %v932_v36, %v931_v33  ;;  %658 = vst.msk [vmem:[%s2075_s2 + $0xb0] sm:$0xff] %vm635_vm1, %v1186_v39  ;;  %v460_v43 = vpop.f32.mrb[21].mxu0  ;;  %v738_v44 = vadd.f32 %v737_v37, %v736_v32  ;;  %v855_v54 = vmul.f32 %v1186_v39, %v1186_v39  ;;  %v743_v60 = vsel %vm635_vm1, %v1186_v39, 0.0 }
 0x103   :  { %656 = vst.msk [vmem:[%s2075_s2 + $0xa0] sm:$0xff] %vm635_vm1, %v460_v43  ;;  %v739_v48 = vsel %vm635_vm1, %v460_v43, 0.0  ;;  %v853_v49 = vmul.f32 %v460_v43, %v460_v43  ;;  %v1187_v50 = vpop.f32.mrb[22].mxu0  ;;  %v1724_v0 = vpop.f32.mrb[16].mxu1 }
 0x104   :  { %v740_v51 = vadd.f32 %v739_v48, %v738_v44  ;;  %v935_v52 = vadd.f32 %v934_v47, %v933_v41  ;;  %659 = vst.msk [vmem:[%s2075_s2 + $0xb8] sm:$0xff] %vm635_vm1, %v1187_v50  ;;  %v463_v53 = vpop.f32.mrb[23].mxu0  ;;  %v856_v61 = vmul.f32 %v1187_v50, %v1187_v50  ;;  %686 = vst.msk [vmem:[%s2075_s2 + $0x190] sm:$0xff] %vm635_vm1, %v1724_v0  ;;  %v1731_v4 = vpop.f32.mrb[17].mxu1  ;;  %v940_v5 = vsel %vm635_vm1, %v855_v54, 0.0 }
 0x105   :  { %v936_v55 = vsel %vm635_vm1, %v853_v49, 0.0  ;;  %657 = vst.msk [vmem:[%s2075_s2 + $0xa8] sm:$0xff] %vm635_vm1, %v463_v53  ;;  %v741_v56 = vsel %vm635_vm1, %v463_v53, 0.0  ;;  %v854_v57 = vmul.f32 %v463_v53, %v463_v53  ;;  %v745_v8 = vsel %vm635_vm1, %v1187_v50, 0.0  ;;  %684 = vst.msk [vmem:[%s2075_s2 + $0x180] sm:$0xff] %vm635_vm1, %v1731_v4  ;;  %v1740_v11 = vpop.f32.mrb[18].mxu1 }
 0x106   :  { %v937_v58 = vadd.f32 %v936_v55, %v935_v52  ;;  %v742_v59 = vadd.f32 %v741_v56, %v740_v51  ;;  %687 = vst.msk [vmem:[%s2075_s2 + $0x198] sm:$0xff] %vm635_vm1, %v1740_v11  ;;  %v1751_v17 = vpop.f32.mrb[19].mxu1  ;;  %v942_v19 = vsel %vm635_vm1, %v856_v61, 0.0 }
 0x107   :  { %v938_v62 = vsel %vm635_vm1, %v854_v57, 0.0  ;;  %685 = vst.msk [vmem:[%s2075_s2 + $0x188] sm:$0xff] %vm635_vm1, %v1751_v17 }
 0x108   :  { %v744_v1 = vadd.f32 %v743_v60, %v742_v59  ;;  %v939_v3 = vadd.f32 %v938_v62, %v937_v58 }
 0x109   :  { %v1190_v9 = vpop.f32.mrb[24].mxu0 }
 0x10a   :  { %v941_v13 = vadd.f32 %v940_v5, %v939_v3  ;;  %662 = vst.msk [vmem:[%s2075_s2 + $0xd0] sm:$0xff] %vm635_vm1, %v1190_v9  ;;  %v476_v15 = vpop.f32.mrb[25].mxu0  ;;  %v746_v16 = vadd.f32 %v745_v8, %v744_v1  ;;  %v859_v26 = vmul.f32 %v1190_v9, %v1190_v9  ;;  %v751_v33 = vsel %vm635_vm1, %v1190_v9, 0.0 }
 0x10b   :  { %660 = vst.msk [vmem:[%s2075_s2 + $0xc0] sm:$0xff] %vm635_vm1, %v476_v15  ;;  %v747_v20 = vsel %vm635_vm1, %v476_v15, 0.0  ;;  %v857_v21 = vmul.f32 %v476_v15, %v476_v15  ;;  %v1191_v22 = vpop.f32.mrb[26].mxu0  ;;  %v1776_v39 = vpop.f32.mrb[20].mxu1 }
 0x10c   :  { %v748_v23 = vadd.f32 %v747_v20, %v746_v16  ;;  %v943_v24 = vadd.f32 %v942_v19, %v941_v13  ;;  %663 = vst.msk [vmem:[%s2075_s2 + $0xd8] sm:$0xff] %vm635_vm1, %v1191_v22  ;;  %v479_v25 = vpop.f32.mrb[27].mxu0  ;;  %v860_v36 = vmul.f32 %v1191_v22, %v1191_v22  ;;  %690 = vst.msk [vmem:[%s2075_s2 + $0x1b0] sm:$0xff] %vm635_vm1, %v1776_v39  ;;  %v1783_v44 = vpop.f32.mrb[21].mxu1  ;;  %v948_v47 = vsel %vm635_vm1, %v859_v26, 0.0 }
 0x10d   :  { %v944_v27 = vsel %vm635_vm1, %v857_v21, 0.0  ;;  %661 = vst.msk [vmem:[%s2075_s2 + $0xc8] sm:$0xff] %vm635_vm1, %v479_v25  ;;  %v749_v28 = vsel %vm635_vm1, %v479_v25, 0.0  ;;  %v858_v29 = vmul.f32 %v479_v25, %v479_v25  ;;  %v753_v48 = vsel %vm635_vm1, %v1191_v22, 0.0  ;;  %688 = vst.msk [vmem:[%s2075_s2 + $0x1a0] sm:$0xff] %vm635_vm1, %v1783_v44  ;;  %v1792_v50 = vpop.f32.mrb[22].mxu1 }
 0x10e   :  { %v945_v30 = vadd.f32 %v944_v27, %v943_v24  ;;  %v750_v32 = vadd.f32 %v749_v28, %v748_v23  ;;  %691 = vst.msk [vmem:[%s2075_s2 + $0x1b8] sm:$0xff] %vm635_vm1, %v1792_v50  ;;  %v1803_v54 = vpop.f32.mrb[23].mxu1  ;;  %v950_v55 = vsel %vm635_vm1, %v860_v36, 0.0  ;;  %v865_v19 = vmul.f32 %v1523_v10, %v1523_v10 }
 0x10f   :  { %v946_v37 = vsel %vm635_vm1, %v858_v29, 0.0  ;;  %689 = vst.msk [vmem:[%s2075_s2 + $0x1a8] sm:$0xff] %vm635_vm1, %v1803_v54  ;;  %v763_v26 = vsel %vm635_vm1, %v1523_v10, 0.0 }
 0x110   :  { %v752_v41 = vadd.f32 %v751_v33, %v750_v32  ;;  %v947_v43 = vadd.f32 %v946_v37, %v945_v30  ;;  %v960_v32 = vsel %vm635_vm1, %v865_v19, 0.0  ;;  %v866_v33 = vmul.f32 %v1543_v18, %v1543_v18 }
 0x111   :  { %v1194_v49 = vpop.f32.mrb[28].mxu0  ;;  %v775_v19 = vsel %vm635_vm1, %v1568_v35, 0.0 }
 0x112   :  { %v949_v51 = vadd.f32 %v948_v47, %v947_v43  ;;  %666 = vst.msk [vmem:[%s2075_s2 + $0xf0] sm:$0xff] %vm635_vm1, %v1194_v49  ;;  %v492_v52 = vpop.f32.mrb[29].mxu0  ;;  %v754_v53 = vadd.f32 %v753_v48, %v752_v41  ;;  %v863_v62 = vmul.f32 %v1194_v49, %v1194_v49  ;;  %v759_v13 = vsel %vm635_vm1, %v1194_v49, 0.0 }
 0x113   :  { %664 = vst.msk [vmem:[%s2075_s2 + $0xe0] sm:$0xff] %vm635_vm1, %v492_v52  ;;  %v755_v56 = vsel %vm635_vm1, %v492_v52, 0.0  ;;  %v861_v57 = vmul.f32 %v492_v52, %v492_v52  ;;  %v1195_v58 = vpop.f32.mrb[30].mxu0  ;;  %v1830_v20 = vpop.f32.mrb[24].mxu1  ;;  %v867_v41 = vmul.f32 %v1516_v7, %v1516_v7  ;;  %v765_v43 = vsel %vm635_vm1, %v1543_v18, 0.0 }
 0x114   :  { %v756_v59 = vadd.f32 %v755_v56, %v754_v53  ;;  %v951_v60 = vadd.f32 %v950_v55, %v949_v51  ;;  %667 = vst.msk [vmem:[%s2075_s2 + $0xf8] sm:$0xff] %vm635_vm1, %v1195_v58  ;;  %v495_v61 = vpop.f32.mrb[31].mxu0  ;;  %v864_v15 = vmul.f32 %v1195_v58, %v1195_v58  ;;  %694 = vst.msk [vmem:[%s2075_s2 + $0x1d0] sm:$0xff] %vm635_vm1, %v1830_v20  ;;  %v1837_v23 = vpop.f32.mrb[25].mxu1  ;;  %v956_v24 = vsel %vm635_vm1, %v863_v62, 0.0 }
 0x115   :  { %v952_v1 = vsel %vm635_vm1, %v861_v57, 0.0  ;;  %665 = vst.msk [vmem:[%s2075_s2 + $0xe8] sm:$0xff] %vm635_vm1, %v495_v61  ;;  %v757_v3 = vsel %vm635_vm1, %v495_v61, 0.0  ;;  %v862_v5 = vmul.f32 %v495_v61, %v495_v61  ;;  %v761_v25 = vsel %vm635_vm1, %v1195_v58, 0.0  ;;  %692 = vst.msk [vmem:[%s2075_s2 + $0x1c0] sm:$0xff] %vm635_vm1, %v1837_v23  ;;  %v1848_v27 = vpop.f32.mrb[26].mxu1 }
 0x116   :  { %v953_v8 = vadd.f32 %v952_v1, %v951_v60  ;;  %v758_v9 = vadd.f32 %v757_v3, %v756_v59  ;;  %695 = vst.msk [vmem:[%s2075_s2 + $0x1d8] sm:$0xff] %vm635_vm1, %v1848_v27  ;;  %v1855_v30 = vpop.f32.mrb[27].mxu1  ;;  %v958_v10 = vsel %vm635_vm1, %v864_v15, 0.0  ;;  %v767_v49 = vsel %vm635_vm1, %v1516_v7, 0.0 }
 0x117   :  { %v954_v16 = vsel %vm635_vm1, %v862_v5, 0.0  ;;  %693 = vst.msk [vmem:[%s2075_s2 + $0x1c8] sm:$0xff] %vm635_vm1, %v1855_v30  ;;  %v868_v51 = vmul.f32 %v1532_v14, %v1532_v14  ;;  %v962_v52 = vsel %vm635_vm1, %v866_v33, 0.0  ;;  %v869_v53 = vmul.f32 %v1575_v38, %v1575_v38 }
 0x118   :  { %v760_v21 = vadd.f32 %v759_v13, %v758_v9  ;;  %v955_v22 = vadd.f32 %v954_v16, %v953_v8  ;;  %v964_v7 = vsel %vm635_vm1, %v867_v41, 0.0  ;;  %v769_v58 = vsel %vm635_vm1, %v1532_v14, 0.0 }
 0x119   :  { %v771_v59 = vsel %vm635_vm1, %v1575_v38, 0.0  ;;  %v966_v38 = vsel %vm635_vm1, %v868_v51, 0.0  ;;  %v968_v1 = vsel %vm635_vm1, %v869_v53, 0.0  ;;  %v870_v3 = vmul.f32 %v1595_v46, %v1595_v46 }
 0x11a   :  { %v957_v28 = vadd.f32 %v956_v24, %v955_v22  ;;  %v762_v29 = vadd.f32 %v761_v25, %v760_v21  ;;  %v871_v9 = vmul.f32 %v1568_v35, %v1568_v35  ;;  %v773_v13 = vsel %vm635_vm1, %v1595_v46, 0.0 }
 0x11b   :  { %v1877_v55 = vpop.f32.mrb[28].mxu1  ;;  %v872_v21 = vmul.f32 %v1584_v42, %v1584_v42  ;;  %v970_v22 = vsel %vm635_vm1, %v870_v3, 0.0  ;;  %v873_v24 = vmul.f32 %v1627_v2, %v1627_v2  ;;  %v777_v46 = vsel %vm635_vm1, %v1584_v42, 0.0 }
 0x11c   :  { %v764_v36 = vadd.f32 %v763_v26, %v762_v29  ;;  %v959_v37 = vadd.f32 %v958_v10, %v957_v28  ;;  %698 = vst.msk [vmem:[%s2075_s2 + $0x1f0] sm:$0xff] %vm635_vm1, %v1877_v55  ;;  %v1884_v18 = vpop.f32.mrb[29].mxu1  ;;  %v972_v28 = vsel %vm635_vm1, %v871_v9, 0.0  ;;  %v779_v29 = vsel %vm635_vm1, %v1627_v2, 0.0 }
 0x11d   :  { %696 = vst.msk [vmem:[%s2075_s2 + $0x1e0] sm:$0xff] %vm635_vm1, %v1884_v18  ;;  %v1896_v60 = vpop.f32.mrb[30].mxu1  ;;  %v976_v33 = vsel %vm635_vm1, %v873_v24, 0.0  ;;  %v781_v42 = vsel %vm635_vm1, %v1647_v12, 0.0  ;;  %v783_v2 = vsel %vm635_vm1, %v1620_v63, 0.0  ;;  %v879_v3 = vmul.f32 %v1672_v31, %v1672_v31 }
 0x11e   :  { %v961_v47 = vadd.f32 %v960_v32, %v959_v37  ;;  %v766_v48 = vadd.f32 %v765_v43, %v764_v36  ;;  %699 = vst.msk [vmem:[%s2075_s2 + $0x1f8] sm:$0xff] %vm635_vm1, %v1896_v60  ;;  %v1903_v14 = vpop.f32.mrb[31].mxu1  ;;  %v974_v32 = vsel %vm635_vm1, %v872_v21, 0.0  ;;  %v874_v36 = vmul.f32 %v1647_v12, %v1647_v12 }
 0x11f   :  { %697 = vst.msk [vmem:[%s2075_s2 + $0x1e8] sm:$0xff] %vm635_vm1, %v1903_v14  ;;  %v875_v43 = vmul.f32 %v1620_v63, %v1620_v63  ;;  %v785_v12 = vsel %vm635_vm1, %v1636_v6, 0.0  ;;  %v880_v9 = vmul.f32 %v1688_v40, %v1688_v40  ;;  %v988_v21 = vsel %vm635_vm1, %v879_v3, 0.0  ;;  %s1313_s2 = smov [#allocation2]  }
 0x120   :  { %v768_v56 = vadd.f32 %v767_v49, %v766_v48  ;;  %v963_v57 = vadd.f32 %v962_v52, %v961_v47  ;;  %v876_v49 = vmul.f32 %v1636_v6, %v1636_v6  ;;  %v978_v51 = vsel %vm635_vm1, %v874_v36, 0.0  ;;  %s1040_s15 = sshll.u32 %s1313_s2, 4  ;;  %s1041_s15 = int_to_ptr.vmem [resolvable:$true] %s1040_s15 }
 0x121   :  { %v877_v52 = vmul.f32 %v1679_v34, %v1679_v34  ;;  %v789_v6 = vsel %vm635_vm1, %v1699_v45, 0.0  ;;  %s1265_s18 = scalar_lea.vmem %s1041_s15, 128  ;;  %p1270_p1 = scmp.lt.s32.totalorder %s1041_s15, %s1041_s15 }
 0x122   :  { %v965_v61 = vadd.f32 %v964_v7, %v963_v57  ;;  %v770_v62 = vadd.f32 %v769_v58, %v768_v56  ;;  %v980_v57 = vsel %vm635_vm1, %v875_v43, 0.0  ;;  %v787_v7 = vsel %vm635_vm1, %v1679_v34, 0.0  ;;  %p1266_p0 = scmp.ne.s32.totalorder %s1041_s15, %s1265_s18  ;;  %p1271_p2 = scmp.lt.s32.totalorder %s1265_s18, %s1265_s18 }
 0x123   :  { %v791_v34 = vsel %vm635_vm1, %v1672_v31, 0.0 }
 0x124   :  { %v772_v5 = vadd.f32 %v771_v59, %v770_v62  ;;  %v967_v8 = vadd.f32 %v966_v38, %v965_v61  ;;  %v982_v59 = vsel %vm635_vm1, %v876_v49, 0.0  ;;  %v984_v61 = vsel %vm635_vm1, %v877_v52, 0.0  ;;  %p1272_p3 = por %p1271_p2, %p1270_p1 }
 0x125   :  { %v878_v62 = vmul.f32 %v1699_v45, %v1699_v45  ;;  %v793_v45 = vsel %vm635_vm1, %v1688_v40, 0.0  ;;  %v797_v40 = vsel %vm635_vm1, %v1751_v17, 0.0 }
 0x126   :  { %v969_v15 = vadd.f32 %v968_v1, %v967_v8  ;;  %v774_v16 = vadd.f32 %v773_v13, %v772_v5  ;;  %p1273_p4 = pnand %p1272_p3, %p1266_p0 }
 0x127   :  { %v986_v13 = vsel %vm635_vm1, %v878_v62, 0.0 }
 0x128   :  { %v776_v25 = vadd.f32 %v775_v19, %v774_v16  ;;  %v971_v26 = vadd.f32 %v970_v22, %v969_v15  ;;  %v881_v15 = vmul.f32 %v1731_v4, %v1731_v4  ;;  %v795_v22 = vsel %vm635_vm1, %v1731_v4, 0.0 }
 0x129   :  { %v799_v4 = vsel %vm635_vm1, %v1724_v0, 0.0 }
 0x12a   :  { %v973_v10 = vadd.f32 %v972_v28, %v971_v26  ;;  %v778_v35 = vadd.f32 %v777_v46, %v776_v25  ;;  %v990_v25 = vsel %vm635_vm1, %v880_v9, 0.0  ;;  %v992_v26 = vsel %vm635_vm1, %v881_v15, 0.0 }
 0x12b   :  { %v882_v28 = vmul.f32 %v1751_v17, %v1751_v17  ;;  %v801_v17 = vsel %vm635_vm1, %v1740_v11, 0.0  ;;  %v891_v9 = vmul.f32 %v1830_v20, %v1830_v20 }
 0x12c   :  { %v780_v37 = vadd.f32 %v779_v29, %v778_v35  ;;  %v975_v41 = vadd.f32 %v974_v32, %v973_v10  ;;  %v883_v10 = vmul.f32 %v1724_v0, %v1724_v0 }
 0x12d   :  { %v994_v36 = vsel %vm635_vm1, %v882_v28, 0.0 }
 0x12e   :  { %v977_v47 = vadd.f32 %v976_v33, %v975_v41  ;;  %v782_v48 = vadd.f32 %v781_v42, %v780_v37  ;;  %v884_v33 = vmul.f32 %v1740_v11, %v1740_v11  ;;  %v885_v37 = vmul.f32 %v1783_v44, %v1783_v44 }
 0x12f   :  { %v996_v42 = vsel %vm635_vm1, %v883_v10, 0.0  ;;  %v805_v11 = vsel %vm635_vm1, %v1803_v54, 0.0 }
 0x130   :  { %v784_v53 = vadd.f32 %v783_v2, %v782_v48  ;;  %v979_v56 = vadd.f32 %v978_v51, %v977_v47  ;;  %v803_v47 = vsel %vm635_vm1, %v1783_v44, 0.0  ;;  %v998_v2 = vsel %vm635_vm1, %v884_v33, 0.0 }
 0x131   :  { %v1000_v49 = vsel %vm635_vm1, %v885_v37, 0.0  ;;  %v886_v51 = vmul.f32 %v1803_v54, %v1803_v54  ;;  %v807_v44 = vsel %vm635_vm1, %v1776_v39, 0.0  ;;  %v809_v54 = vsel %vm635_vm1, %v1792_v50, 0.0 }
 0x132   :  { %v981_v58 = vadd.f32 %v980_v57, %v979_v56  ;;  %v786_v63 = vadd.f32 %v785_v12, %v784_v53  ;;  %v887_v56 = vmul.f32 %v1776_v39, %v1776_v39 }
 0x134   :  { %v788_v38 = vadd.f32 %v787_v7, %v786_v63  ;;  %v983_v1 = vadd.f32 %v982_v59, %v981_v58  ;;  %v888_v7 = vmul.f32 %v1792_v50, %v1792_v50  ;;  %v1002_v58 = vsel %vm635_vm1, %v886_v51, 0.0 }
 0x135   :  { %v889_v63 = vmul.f32 %v1837_v23, %v1837_v23  ;;  %v1004_v62 = vsel %vm635_vm1, %v887_v56, 0.0  ;;  %v813_v50 = vsel %vm635_vm1, %v1855_v30, 0.0 }
 0x136   :  { %v985_v5 = vadd.f32 %v984_v61, %v983_v1  ;;  %v790_v8 = vadd.f32 %v789_v6, %v788_v38  ;;  %v811_v38 = vsel %vm635_vm1, %v1837_v23, 0.0  ;;  %v1006_v3 = vsel %vm635_vm1, %v888_v7, 0.0 }
 0x137   :  { %v1008_v6 = vsel %vm635_vm1, %v889_v63, 0.0  ;;  %v815_v23 = vsel %vm635_vm1, %v1830_v20, 0.0 }
 0x138   :  { %v792_v16 = vadd.f32 %v791_v34, %v790_v8  ;;  %v987_v19 = vadd.f32 %v986_v13, %v985_v5  ;;  %v890_v5 = vmul.f32 %v1855_v30, %v1855_v30  ;;  %v817_v30 = vsel %vm635_vm1, %v1848_v27, 0.0 }
 0x13a   :  { %v989_v24 = vadd.f32 %v988_v21, %v987_v19  ;;  %v794_v31 = vadd.f32 %v793_v45, %v792_v16  ;;  %v892_v16 = vmul.f32 %v1848_v27, %v1848_v27  ;;  %v1010_v19 = vsel %vm635_vm1, %v890_v5, 0.0 }
 0x13b   :  { %v893_v21 = vmul.f32 %v1884_v18, %v1884_v18  ;;  %v821_v27 = vsel %vm635_vm1, %v1903_v14, 0.0 }
 0x13c   :  { %v796_v46 = vadd.f32 %v795_v22, %v794_v31  ;;  %v991_v29 = vadd.f32 %v990_v25, %v989_v24  ;;  %v1012_v24 = vsel %vm635_vm1, %v891_v9, 0.0  ;;  %v819_v31 = vsel %vm635_vm1, %v1884_v18, 0.0 }
 0x13d   :  { %v1016_v28 = vsel %vm635_vm1, %v893_v21, 0.0  ;;  %v823_v18 = vsel %vm635_vm1, %v1877_v55, 0.0 }
 0x13e   :  { %v993_v35 = vadd.f32 %v992_v26, %v991_v29  ;;  %v798_v32 = vadd.f32 %v797_v40, %v796_v46  ;;  %v1014_v26 = vsel %vm635_vm1, %v892_v16, 0.0  ;;  %v894_v46 = vmul.f32 %v1903_v14, %v1903_v14 }
 0x13f   :  { %v895_v40 = vmul.f32 %v1877_v55, %v1877_v55 }
 0x140   :  { %v800_v41 = vadd.f32 %v799_v4, %v798_v32  ;;  %v995_v43 = vadd.f32 %v994_v36, %v993_v35  ;;  %v896_v4 = vmul.f32 %v1896_v60, %v1896_v60  ;;  %v1018_v33 = vsel %vm635_vm1, %v894_v46, 0.0 }
 0x142   :  { %v997_v48 = vadd.f32 %v996_v42, %v995_v43  ;;  %v802_v0 = vadd.f32 %v801_v17, %v800_v41  ;;  %v1020_v41 = vsel %vm635_vm1, %v895_v40, 0.0  ;;  %v825_v43 = vsel %vm635_vm1, %v1896_v60, 0.0 }
 0x143   :  { %v1022_v14 = vsel %vm635_vm1, %v896_v4, 0.0 }
 0x144   :  { %v804_v52 = vadd.f32 %v803_v47, %v802_v0  ;;  %v999_v53 = vadd.f32 %v998_v2, %v997_v48 }
 0x146   :  { %v1001_v57 = vadd.f32 %v1000_v49, %v999_v53  ;;  %v806_v12 = vadd.f32 %v805_v11, %v804_v52 }
 0x148   :  { %v808_v59 = vadd.f32 %v807_v44, %v806_v12  ;;  %v1003_v61 = vadd.f32 %v1002_v58, %v1001_v57 }
 0x14a   :  { %v1005_v1 = vadd.f32 %v1004_v62, %v1003_v61  ;;  %v810_v39 = vadd.f32 %v809_v54, %v808_v59 }
 0x14c   :  { %v812_v8 = vadd.f32 %v811_v38, %v810_v39  ;;  %v1007_v34 = vadd.f32 %v1006_v3, %v1005_v1 }
 0x14e   :  { %v1009_v13 = vadd.f32 %v1008_v6, %v1007_v34  ;;  %v814_v15 = vadd.f32 %v813_v50, %v812_v8 }
 0x150   :  { %v816_v45 = vadd.f32 %v815_v23, %v814_v15  ;;  %v1011_v22 = vadd.f32 %v1010_v19, %v1009_v13 }
 0x152   :  { %v1013_v25 = vadd.f32 %v1012_v24, %v1011_v22  ;;  %v818_v20 = vadd.f32 %v817_v30, %v816_v45 }
 0x154   :  { %v820_v29 = vadd.f32 %v819_v31, %v818_v20  ;;  %v1015_v10 = vadd.f32 %v1014_v26, %v1013_v25 }
 0x156   :  { %v1017_v35 = vadd.f32 %v1016_v28, %v1015_v10  ;;  %v822_v32 = vadd.f32 %v821_v27, %v820_v29 }
 0x158   :  { %v824_v36 = vadd.f32 %v823_v18, %v822_v32  ;;  %v1019_v37 = vadd.f32 %v1018_v33, %v1017_v35 }
 0x15a   :  { %v826_v42 = vadd.f32 %v825_v43, %v824_v36  ;;  %v1021_v17 = vadd.f32 %v1020_v41, %v1019_v37 }
 0x15c   :  { %v1023_v47 = vadd.f32 %v1022_v14, %v1021_v17  ;;  %v827_v48 = vrot.slane %v826_v42, 4 }
 0x15e   :  { %v828_v0 = vadd.f32 %v827_v48, %v826_v42  ;;  %v1024_v55 = vrot.slane %v1023_v47, 4 }
 0x160   :  { %v829_v2 = vrot.slane %v828_v0, 2  ;;  %v1025_v49 = vadd.f32 %v1024_v55, %v1023_v47 }
 0x162   :  { %v830_v51 = vadd.f32 %v829_v2, %v828_v0  ;;  %v1026_v52 = vrot.slane %v1025_v49, 2 }
 0x164   :  { %v831_v53 = vrot.slane %v830_v51, 1  ;;  %v1027_v56 = vadd.f32 %v1026_v52, %v1025_v49 }
 0x166   :  { %v832_v11 = vadd.f32 %v831_v53, %v830_v51  ;;  %v1028_v60 = vrot.slane %v1027_v56, 1 }
 0x168   :  { %1030 = vst.msk [vmem:[#allocation2] sm:$0xff] %vm635_vm1, %v832_v11  ;;  %v1029_v57 = vadd.f32 %v1028_v60, %v1027_v56 }
 0x169   :  { %1276 = shalt.err (!%p1273_p4)
}
 0x16a   :  { %s1277_s21 = scalar_lea.hbm %s2076_s3, 128 }
 0x16b   :  { %p1278_p5 = scmp.ne.s32.totalorder %s2076_s3, %s1277_s21  ;;  %p1281_p6 = scmp.lt.u32.totalorder %s1277_s21, %s2076_s3 }
 0x16d   :  { %p1283_p7 = pnand %p1281_p6, %p1278_p5 }
 0x16f   :  { %1286 = shalt.err (!%p1283_p7)
}
 0x170   :  { %1043 = dma.vmem_to_hbm [thread:$0]  %s1041_s15, 128, %s2076_s3, [#allocation3]   ;;  %1031 = vst.msk [vmem:[#allocation4] sm:$0xff] %vm635_vm1, %v1029_v57 }
 0x171   :  { %s1287_s27 = scalar_lea.vmem %s1051_s17, 128  ;;  %p1292_p9 = scmp.lt.s32.totalorder %s1051_s17, %s1051_s17 }
 0x172   :  { %p1288_p8 = scmp.ne.s32.totalorder %s1051_s17, %s1287_s27  ;;  %p1293_p10 = scmp.lt.s32.totalorder %s1287_s27, %s1287_s27 }
 0x174   :  { %p1294_p11 = por %p1293_p10, %p1292_p9 }
 0x176   :  { %p1295_p12 = pnand %p1294_p11, %p1288_p8 }
 0x178   :  { %1298 = shalt.err (!%p1295_p12)
}
 0x179   :  { %s1299_s30 = scalar_lea.hbm %s2077_s4, 128 }
 0x17a   :  { %p1300_p13 = scmp.ne.s32.totalorder %s2077_s4, %s1299_s30  ;;  %p1303_p0 = scmp.lt.u32.totalorder %s1299_s30, %s2077_s4 }
 0x17c   :  { %p1305_p1 = pnand %p1303_p0, %p1300_p13 }
 0x17e   :  { %1308 = shalt.err (!%p1305_p1)
}
 0x17f   :  { %1053 = dma.vmem_to_hbm [thread:$0]  %s1051_s17, 128, %s2077_s4, [#allocation5]  }
 0x180   :  { %1309 = dma.done.wait [#allocation3], 128  }
 0x181   :  { %1310 = vsyncadd [#allocation3], 4294967168 }
 0x182   :  { %1311 = dma.done.wait [#allocation5], 128  }
 0x183   :  { %1312 = vsyncadd [#allocation5], 4294967168 }
 0x184   :  { %1062 = vsyncpa [#allocation3], 1 }
 0x185   :  { %1063 = vsyncpa [#allocation5], 1 }

</bundles_post_ra>
